<compile_context>
chip_gen: v7x
topology: tpu7x:2x2x1
jax: 0.10.0
libtpu: 0.0.40
codegen_flags: <defaults>
</compile_context>

<pallas_src>
import functools
import math

import jax
import jax.numpy as jnp
from jax import lax
from jax.experimental import pallas as pl
from jax.experimental.pallas import tpu as pltpu


_VMEM_LIMIT = 40 * 1024 * 1024


def _row_tile(n, target):
    """Largest sublane tile <= target that is a multiple of 8 (or the full dim)."""
    if n % 8 == 0:
        return min(target, n)
    if n > 8:
        return min(target, (n // 8) * 8)
    return n


def _col_tile(n, target):
    """Lane tile: a multiple of 128 (lane-dense stores) or the full dim."""
    if n % 128 == 0:
        return min(target, n)
    return n


# ----------------------------- linear (x @ W + b) -----------------------------

def _linear_kernel(x_ref, w_ref, b_ref, o_ref):
    # Full-K matmul on the MXU; native-dtype operands, f32 accumulation.
    acc = jnp.dot(x_ref[...], w_ref[...], preferred_element_type=jnp.float32)
    acc = acc + b_ref[...].astype(jnp.float32)
    o_ref[...] = acc.astype(o_ref.dtype)


def linear(x2, w, b, *, tm_target=512, tn_target=512):
    """y = x2 @ w + b.   x2: (rows, H_in), w: (H_in, H_out), b: (H_out,)."""
    rows, h_in = x2.shape
    h_out = w.shape[1]
    b2 = b.reshape(1, h_out)

    tm = _row_tile(rows, tm_target)
    tn = _col_tile(h_out, tn_target)
    grid = (pl.cdiv(rows, tm), pl.cdiv(h_out, tn))

    return pl.pallas_call(
        _linear_kernel,
        out_shape=jax.ShapeDtypeStruct((rows, h_out), x2.dtype),
        grid_spec=pltpu.PrefetchScalarGridSpec(
            num_scalar_prefetch=0,
            grid=grid,
            in_specs=[
                pl.BlockSpec((tm, h_in), lambda i, j: (i, 0)),
                pl.BlockSpec((h_in, tn), lambda i, j: (0, j)),
                pl.BlockSpec((1, tn), lambda i, j: (0, j)),
            ],
            out_specs=pl.BlockSpec((tm, tn), lambda i, j: (i, j)),
        ),
        compiler_params=pltpu.CompilerParams(
            dimension_semantics=("parallel", "parallel"),
            vmem_limit_bytes=_VMEM_LIMIT,
        ),
    )(x2, w, b2)


# ------------------------- multi-head attention core --------------------------

def _attention_kernel(*refs, num_heads, head_dim, scale, has_mask, approx_recip):
    if has_mask:
        q_ref, k_ref, v_ref, m_ref, o_ref = refs
    else:
        q_ref, k_ref, v_ref, o_ref = refs

    if has_mask:
        # Additive mask bias, computed once per (b, q-tile) and reused by every
        # head (mask stays in whatever dtype the caller passed; upcast here).
        bias = (1.0 - m_ref[0].astype(jnp.float32)) * (-10000.0)   # (tq, Skv)

    d = head_dim
    # Static unroll over heads: per-head intermediates die each iteration; the
    # output HBM writeback stays one lane-dense (tq, H) block per grid step.
    for h in range(num_heads):
        lo, hi = h * d, (h + 1) * d
        qh = q_ref[0, :, lo:hi]                     # (tq, d), native dtype
        kh = k_ref[0, :, lo:hi]                     # (Skv, d)
        vh = v_ref[0, :, lo:hi]                     # (Skv, d)
        if scale != 1.0:
            qh = qh * scale                         # fold 1/sqrt(d) into Q (d-wide)

        # scores = q @ k.T on the MXU, f32 accumulation, no explicit transpose.
        s = lax.dot_general(qh, kh, (((1,), (1,)), ((), ())),
                            preferred_element_type=jnp.float32)    # (tq, Skv)
        if has_mask:
            s = s + bias

        # Numerically stable softmax with deferred normalization.
        s_max = jnp.max(s, axis=-1, keepdims=True)
        p = jnp.exp(s - s_max)
        l = jnp.sum(p, axis=-1, keepdims=True)
        # TODO(synk): attention-prob dropout is an inference no-op; not applied.
        ctx = jnp.dot(p.astype(vh.dtype), vh,
                      preferred_element_type=jnp.float32)          # (tq, d)
        ctx = ctx * pl.reciprocal(l, approx=approx_recip)
        o_ref[0, :, lo:hi] = ctx.astype(o_ref.dtype)


def attention(q_arr, k_arr, v_arr, mask, *, num_heads, hidden,
              q_col=0, k_col=0, v_col=0, attention_scale=True, tq_target=256):
    """q_arr/k_arr/v_arr: (B, S, C*hidden) with the Q/K/V slab at column block
    q_col/k_col/v_col (C=1 for separate projections, C=3 for fused QKV).
    mask: (B, Sq, Skv) of 0/1 or None.  Returns context (B, Sq, hidden)."""
    B, Sq = q_arr.shape[0], q_arr.shape[1]
    Skv = k_arr.shape[1]
    d = hidden // num_heads
    scale = (1.0 / math.sqrt(d)) if attention_scale else 1.0

    tq = _row_tile(Sq, tq_target)
    grid = (B, pl.cdiv(Sq, tq))
    has_mask = mask is not None

    kernel = functools.partial(
        _attention_kernel, num_heads=num_heads, head_dim=d, scale=scale,
        has_mask=has_mask,
        # exact reciprocal for f32 I/O; EUP approx reciprocal when bf16 round-off
        # already dominates.
        approx_recip=(q_arr.dtype != jnp.float32))

    in_specs = [
        pl.BlockSpec((1, tq, hidden), lambda b, qi, c=q_col: (b, qi, c)),
        pl.BlockSpec((1, Skv, hidden), lambda b, qi, c=k_col: (b, 0, c)),
        pl.BlockSpec((1, Skv, hidden), lambda b, qi, c=v_col: (b, 0, c)),
    ]
    args = [q_arr, k_arr, v_arr]
    if has_mask:
        in_specs.append(pl.BlockSpec((1, tq, Skv), lambda b, qi: (b, qi, 0)))
        args.append(mask)

    return pl.pallas_call(
        kernel,
        out_shape=jax.ShapeDtypeStruct((B, Sq, hidden), q_arr.dtype),
        grid_spec=pltpu.PrefetchScalarGridSpec(
            num_scalar_prefetch=0,
            grid=grid,
            in_specs=in_specs,
            out_specs=pl.BlockSpec((1, tq, hidden), lambda b, qi: (b, qi, 0)),
        ),
        compiler_params=pltpu.CompilerParams(
            dimension_semantics=("parallel", "parallel"),
            vmem_limit_bytes=_VMEM_LIMIT,
        ),
    )(*args)


# ------------------------------ full MHA forward ------------------------------

def multihead_attention(query, key, value, params, num_heads,
                        attention_mask=None, attention_scale=True):
    """query: (B, Sq, H); key/value: (B, Skv, H); attention_mask: (B, Sq, Skv) 0/1 or None.

    Weights are stored in (in, out) layout (y = x @ W + b), i.e. W = torch weight.T.
    """
    B, Sq, H = query.shape
    self_attn = (query is key) and (key is value)
    # Direct BlockSpec read of the fused QKV slab needs H to be lane-aligned.
    fuse_direct = self_attn and (H % 128 == 0)

    if fuse_direct:
        # One (H, 3H) projection: reads the activation once, fills the MXU wider,
        # and attention slices Q/K/V out of it via column block indices (no extra
        # HBM slice round trip).
        wqkv = jnp.concatenate([params["wq"], params["wk"], params["wv"]], axis=1)
        bqkv = jnp.concatenate([params["bq"], params["bk"], params["bv"]], axis=0)
        qkv = linear(query.reshape(B * Sq, H), wqkv, bqkv).reshape(B, Sq, 3 * H)
        ctx = attention(qkv, qkv, qkv, attention_mask,
                        num_heads=num_heads, hidden=H,
                        q_col=0, k_col=1, v_col=2,
                        attention_scale=attention_scale)
    else:
        def proj(x, w, b):
            S = x.shape[1]
            return linear(x.reshape(B * S, H), w, b).reshape(B, S, H)
        q = proj(query, params["wq"], params["bq"])
        k = proj(key, params["wk"], params["bk"])
        v = proj(value, params["wv"], params["bv"])
        ctx = attention(q, k, v, attention_mask,
                        num_heads=num_heads, hidden=H,
                        attention_scale=attention_scale)

    out = linear(ctx.reshape(B * Sq, H), params["wo"], params["bo"]).reshape(B, Sq, H)
    # TODO(synk): return_attention_scores=True (also returning raw scores) not implemented.
    return out


# ----------------------------------- tests ------------------------------------

def _make_params(key, H, dtype):
    ks = jax.random.split(key, 8)
    mk_w = lambda k: jax.random.normal(k, (H, H), dtype=dtype) * 0.1
    mk_b = lambda k: jax.random.normal(k, (H,), dtype=dtype) * 0.1
    return dict(wq=mk_w(ks[0]), bq=mk_b(ks[1]),
                wk=mk_w(ks[2]), bk=mk_b(ks[3]),
                wv=mk_w(ks[4]), bv=mk_b(ks[5]),
                wo=mk_w(ks[6]), bo=mk_b(ks[7]))


def _ref_forward(query, key, value, params, num_heads, attention_mask, attention_scale):
    """Plain-JAX reference mirroring the PyTorch forward (eval-mode dropout)."""
    B, Sq, H = query.shape
    d = H // num_heads

    def proj(x, w, b):
        S = x.shape[1]
        y = x.reshape(B * S, H) @ w + b
        return y.reshape(B, S, num_heads, d).transpose(0, 2, 1, 3)

    q = proj(query, params["wq"], params["bq"])
    k = proj(key, params["wk"], params["bk"])
    v = proj(value, params["wv"], params["bv"])
    s = jnp.einsum("bhqd,bhkd->bhqk", q, k)
    if attention_scale:
        s = s / math.sqrt(d)
    if attention_mask is not None:
        s = s + (1.0 - attention_mask[:, None, :, :]) * (-10000.0)
    p = jax.nn.softmax(s, axis=-1)
    ctx = jnp.einsum("bhqk,bhkd->bhqd", p, v)
    ctx = ctx.transpose(0, 2, 1, 3).reshape(B * Sq, H)
    return (ctx @ params["wo"] + params["bo"]).reshape(B, Sq, H)


if __name__ == "__main__":
    root = jax.random.PRNGKey(0)
    dt = jnp.float32

    # --- Test 1: self-attention, fused QKV path (H multiple of 128), masked ---
    B, S, H, nH = 2, 8, 128, 4
    k0, k1, kp1 = jax.random.split(root, 3)
    x = jax.random.normal(k0, (B, S, H), dtype=dt)
    params1 = _make_params(kp1, H, dt)
    mask = jnp.broadcast_to(jnp.tril(jnp.ones((S, S), dtype=dt)), (B, S, S))

    out1 = multihead_attention(x, x, x, params1, nH,
                               attention_mask=mask, attention_scale=True)
    out1 = jax.block_until_ready(out1)
    ref1 = _ref_forward(x, x, x, params1, nH, mask, True)
    err1 = jnp.max(jnp.abs(out1 - ref1))
    assert jnp.allclose(out1, ref1, atol=1e-4, rtol=1e-4), f"test1 mismatch, max|err|={err1}"

    # --- Test 2: cross-attention, separate projections, no mask, no scaling ---
    B2, Sq2, Skv2, H2, nH2 = 2, 8, 16, 32, 4
    kq, kk, kv, kp2 = jax.random.split(k1, 4)
    q_in = jax.random.normal(kq, (B2, Sq2, H2), dtype=dt)
    k_in = jax.random.normal(kk, (B2, Skv2, H2), dtype=dt)
    v_in = jax.random.normal(kv, (B2, Skv2, H2), dtype=dt)
    params2 = _make_params(kp2, H2, dt)

    out2 = multihead_attention(q_in, k_in, v_in, params2, nH2,
                               attention_mask=None, attention_scale=False)
    out2 = jax.block_until_ready(out2)
    ref2 = _ref_forward(q_in, k_in, v_in, params2, nH2, None, False)
    err2 = jnp.max(jnp.abs(out2 - ref2))
    assert jnp.allclose(out2, ref2, atol=1e-4, rtol=1e-4), f"test2 mismatch, max|err|={err2}"

    print("KERNEL_OK")
</pallas_src>

<mosaic_0001>
module attributes {stable_mosaic.version = 11 : i64} {
  func.func @_linear_kernel(%arg0: i32, %arg1: i32, %arg2: memref<16x128xf32, #tpu.memory_space<vmem>>, %arg3: memref<128x384xf32, #tpu.memory_space<vmem>>, %arg4: memref<1x384xf32, #tpu.memory_space<vmem>>, %arg5: memref<16x384xf32, #tpu.memory_space<vmem>>) attributes {dimension_semantics = [#tpu.dimension_semantics<parallel>, #tpu.dimension_semantics<parallel>], iteration_bounds = array<i64: 1, 1>, scalar_prefetch = 0 : i64, scratch_operands = 0 : i64, tpu.core_type = #tpu.core_type<tc>, window_params = [{transform_indices = @transform_0, window_bounds = array<i64: 16, 128>}, {transform_indices = @transform_1, window_bounds = array<i64: 128, 384>}, {transform_indices = @transform_2, window_bounds = array<i64: 1, 384>}, {transform_indices = @transform_3, window_bounds = array<i64: 16, 384>}]} {
    %c0 = arith.constant 0 : index
    %c0_0 = arith.constant 0 : index
    %0 = vector.load %arg2[%c0, %c0_0] : memref<16x128xf32, #tpu.memory_space<vmem>>, vector<16x128xf32>
    %c0_1 = arith.constant 0 : index
    %c0_2 = arith.constant 0 : index
    %1 = vector.load %arg3[%c0_1, %c0_2] : memref<128x384xf32, #tpu.memory_space<vmem>>, vector<128x384xf32>
    %cst = arith.constant dense<0.000000e+00> : vector<16x384xf32>
    %2 = tpu.matmul %0, %1, %cst {dimension_numbers = #tpu.dot_dimension_numbers<[1], [0], [0], [1], [0, 0, 1, 1], [], []>} : vector<16x128xf32>, vector<128x384xf32>, vector<16x384xf32> -> vector<16x384xf32>
    %c0_3 = arith.constant 0 : index
    %c0_4 = arith.constant 0 : index
    %3 = vector.load %arg4[%c0_3, %c0_4] : memref<1x384xf32, #tpu.memory_space<vmem>>, vector<1x384xf32>
    %4 = vector.broadcast %3 : vector<1x384xf32> to vector<16x384xf32>
    %5 = arith.addf %2, %4 : vector<16x384xf32>
    %c0_5 = arith.constant 0 : index
    %c0_6 = arith.constant 0 : index
    %6 = vector.load %arg5[%c0_5, %c0_6] : memref<16x384xf32, #tpu.memory_space<vmem>>, vector<16x384xf32>
    tpu.vector_store %arg5[%c0_5, %c0_6], %5 {strides = array<i32>} : memref<16x384xf32, #tpu.memory_space<vmem>>, vector<16x384xf32>,
    return
  }
  func.func @transform_0(%arg0: i32, %arg1: i32) -> (i32, i32) {
    %c0_i32 = arith.constant 0 : i32
    %c0_i32_0 = arith.constant 0 : i32
    return %arg0, %c0_i32 : i32, i32
  }
  func.func @transform_1(%arg0: i32, %arg1: i32) -> (i32, i32) {
    %c0_i32 = arith.constant 0 : i32
    %c0_i32_0 = arith.constant 0 : i32
    return %c0_i32, %arg1 : i32, i32
  }
  func.func @transform_2(%arg0: i32, %arg1: i32) -> (i32, i32) {
    %c0_i32 = arith.constant 0 : i32
    %c0_i32_0 = arith.constant 0 : i32
    return %c0_i32, %arg1 : i32, i32
  }
  func.func @transform_3(%arg0: i32, %arg1: i32) -> (i32, i32) {
    %c0_i32 = arith.constant 0 : i32
    return %arg0, %arg1 : i32, i32
  }
}

</mosaic_0001>

<bundles_post_ra>
// kernel: tpu_custom_call.1
= control target key start
LH: loop header
LB: loop body
LE: loop exit
PB: predicated region body
PF: predicated region fallthrough
CT: control target
= control target key end

     0   :  { %8 = vsyncpa [#allocation3], 0  ;;  %s558_s0 = inlined_call_operand.hbm [shape: f32[16,128], index: 0, kind: input, shape index: {}]   ;;  %s559_s1 = inlined_call_operand.hbm [shape: f32[128,384], index: 1, kind: input, shape index: {}]   ;;  %s560_s2 = inlined_call_operand.vmem [shape: f32[1,384], index: 2, kind: input, shape index: {}]   ;;  %s561_s3 = inlined_call_operand.hbm [shape: f32[16,384], index: 3, kind: output, shape index: {}]  }
   0x1   :  { %9 = vsyncpa [#allocation6], 0 }
   0x2   :  { %10 = vsyncpa [#allocation4], 0  ;;  %s483_s12 = smov [#allocation2]   ;;  %s411_s16 = scalar_lea.hbm %s558_s0, 256 }
   0x3   :  { %s16_s13 = sshll.u32 %s483_s12, 4  ;;  %p412_p0 = scmp.ne.s32.totalorder %s558_s0, %s411_s16  ;;  %s17_s13 = int_to_ptr.vmem [resolvable:$true] %s16_s13 }
   0x4   :  { %p415_p1 = scmp.lt.u32.totalorder %s411_s16, %s558_s0 }
   0x6   :  { %p417_p2 = pnand %p415_p1, %p412_p0 }
   0x8   :  { %420 = shalt.err (!%p417_p2)
}
   0x9   :  { %s421_s21 = scalar_lea.vmem %s17_s13, 256  ;;  %p426_p4 = scmp.lt.s32.totalorder %s17_s13, %s17_s13 }
   0xa   :  { %p422_p3 = scmp.ne.s32.totalorder %s17_s13, %s421_s21  ;;  %p427_p5 = scmp.lt.s32.totalorder %s421_s21, %s421_s21 }
   0xc   :  { %p428_p6 = por %p427_p5, %p426_p4 }
   0xe   :  { %p429_p7 = pnand %p428_p6, %p422_p3 }
  0x10   :  { %432 = shalt.err (!%p429_p7)
}
  0x11   :  { %s484_s22 = smov 128   ;;  %s485_s23 = smov 8  }
  0x12   :  { %22 = dma.hbm_to_vmem [thread:$0]  %s558_s0, 256, %s17_s13, [#allocation3], %s484_s22, %s484_s22, %s485_s23  }
  0x13   :  { %s486_s26 = smov [#allocation5]   ;;  %s433_s30 = scalar_lea.hbm %s559_s1, 6144 }
  0x14   :  { %s28_s27 = sshll.u32 %s486_s26, 4  ;;  %p434_p8 = scmp.ne.s32.totalorder %s559_s1, %s433_s30  ;;  %s29_s27 = int_to_ptr.vmem [resolvable:$true] %s28_s27 }
  0x15   :  { %p437_p9 = scmp.lt.u32.totalorder %s433_s30, %s559_s1 }
  0x17   :  { %p439_p10 = pnand %p437_p9, %p434_p8 }
  0x19   :  { %442 = shalt.err (!%p439_p10)
}
  0x1a   :  { %s443_s8 = scalar_lea.vmem %s29_s27, 6144  ;;  %p448_p12 = scmp.lt.s32.totalorder %s29_s27, %s29_s27 }
  0x1b   :  { %p444_p11 = scmp.ne.s32.totalorder %s29_s27, %s443_s8  ;;  %p449_p13 = scmp.lt.s32.totalorder %s443_s8, %s443_s8 }
  0x1d   :  { %p450_p0 = por %p449_p13, %p448_p12 }
  0x1f   :  { %p451_p1 = pnand %p450_p0, %p444_p11 }
  0x21   :  { %454 = shalt.err (!%p451_p1)
}
  0x22   :  { %s487_s0 = smov 384   ;;  %s488_s9 = smov 24  }
  0x23   :  { %34 = dma.hbm_to_vmem [thread:$0]  %s559_s1, 6144, %s29_s27, [#allocation6], %s487_s0, %s487_s0, %s488_s9  }
  0x24   :  { %477 = dma.done.wait [#allocation3], 256  }
  0x25   :  { %478 = vsyncadd [#allocation3], 4294967040 }
  0x26   :  { %479 = dma.done.wait [#allocation6], 6144  }
  0x27   :  { %480 = vsyncadd [#allocation6], 4294961152  ;;  %v489_v0 = vmov 0.0   ;;  %v46_v1 = vld [vmem:[#allocation5 + $0x8] sm:$0xff]  ;;  %v49_v2 = vld [vmem:[#allocation5 + $0x20] sm:$0xff]  ;;  %s490_s13 = smov [#allocation7]  }
  0x28   :  { %174 = vmatprep.mubr.f32.mxu0 %v489_v0  ;;  %v45_v3 = vld [vmem:[#allocation5] sm:$0xff]  ;;  %v339_v4 = vpack.c.bf16 %v49_v2, %v46_v1  ;;  %v48_v5 = vld [vmem:[#allocation5 + $0x18] sm:$0xff]  ;;  %v47_v6 = vld [vmem:[#allocation5 + $0x10] sm:$0xff]  ;;  %s273_s14 = sshll.u32 %s490_s13, 4  ;;  %s274_s14 = int_to_ptr.vmem [resolvable:$true] %s273_s14 }
  0x29   :  { %v50_v7 = vld [vmem:[#allocation5 + $0x28] sm:$0xff]  ;;  %v341_v8 = vpack.c.bf16 %v48_v5, %v45_v3  ;;  %v52_v10 = vld [vmem:[#allocation5 + $0x38] sm:$0xff]  ;;  %v55_v11 = vld [vmem:[#allocation5 + $0x50] sm:$0xff]  ;;  %p460_p3 = scmp.lt.s32.totalorder %s274_s14, %s274_s14 }
  0x2a   :  { %v371_v9 = vpack.c.bf16 %v50_v7, %v47_v6  ;;  %v51_v12 = vld [vmem:[#allocation5 + $0x30] sm:$0xff]  ;;  %340 = vmatprep.subr.bf16.mxu0 %v339_v4  ;;  %v343_v13 = vpack.c.bf16 %v55_v11, %v52_v10  ;;  %v54_v14 = vld [vmem:[#allocation5 + $0x48] sm:$0xff]  ;;  %v53_v15 = vld [vmem:[#allocation5 + $0x40] sm:$0xff] }
  0x2b   :  { %v56_v16 = vld [vmem:[#allocation5 + $0x58] sm:$0xff]  ;;  %342 = vmatpush1.bf16.msra.mxu0 %v341_v8  ;;  %v345_v17 = vpack.c.bf16 %v54_v14, %v51_v12  ;;  %v58_v19 = vld [vmem:[#allocation5 + $0x68] sm:$0xff]  ;;  %v61_v20 = vld [vmem:[#allocation5 + $0x80] sm:$0xff]  ;;  %v95_v12 = vlaneseq }
  0x2c   :  { %372 = vmatprep.subr.bf16.mxu1 %v371_v9  ;;  %v375_v18 = vpack.c.bf16 %v56_v16, %v53_v15  ;;  %v57_v21 = vld [vmem:[#allocation5 + $0x60] sm:$0xff]  ;;  %344 = vmatprep.subr.bf16.mxu0 %v343_v13  ;;  %v347_v22 = vpack.c.bf16 %v61_v20, %v58_v19  ;;  %v60_v23 = vld [vmem:[#allocation5 + $0x78] sm:$0xff]  ;;  %v59_v24 = vld [vmem:[#allocation5 + $0x70] sm:$0xff] }
  0x2d   :  { %374 = vmatpush3.bf16.msra.mxu1 %v371_v9  ;;  %v62_v25 = vld [vmem:[#allocation5 + $0x88] sm:$0xff]  ;;  %v64_v27 = vld [vmem:[#allocation5 + $0x98] sm:$0xff]  ;;  %v67_v28 = vld [vmem:[#allocation5 + $0xb0] sm:$0xff]  ;;  %v349_v31 = vpack.c.bf16 %v60_v23, %v57_v21  ;;  %v96_v13 = vshrl.u32 %v95_v12, 7 }
  0x2e   :  { %376 = vmatprep.subr.bf16.mxu1 %v375_v18  ;;  %v379_v26 = vpack.c.bf16 %v62_v25, %v59_v24  ;;  %v65_v29 = vld [vmem:[#allocation5 + $0xa0] sm:$0xff]  ;;  %v68_v30 = vld [vmem:[#allocation5 + $0xb8] sm:$0xff]  ;;  %v351_v32 = vpack.c.bf16 %v67_v28, %v64_v27  ;;  %v63_v33 = vld [vmem:[#allocation5 + $0x90] sm:$0xff] }
  0x2f   :  { %346 = vmatpush1.bf16.msra.mxu0 %v345_v17  ;;  %v66_v34 = vld [vmem:[#allocation5 + $0xa8] sm:$0xff]  ;;  %v383_v35 = vpack.c.bf16 %v68_v30, %v65_v29  ;;  %v73_v37 = vld [vmem:[#allocation5 + $0xe0] sm:$0xff]  ;;  %v71_v38 = vld [vmem:[#allocation5 + $0xd0] sm:$0xff]  ;;  %v97_v14 = vsub.s32 0, %v96_v13  ;;  %v101_v16 = vsub.s32 1, %v96_v13  ;;  %v105_v17 = vsub.s32 2, %v96_v13 }
  0x30   :  { %348 = vmatprep.subr.bf16.mxu0 %v347_v22  ;;  %v70_v36 = vld [vmem:[#allocation5 + $0xc8] sm:$0xff]  ;;  %v353_v40 = vpack.c.bf16 %v66_v34, %v63_v33  ;;  %v69_v42 = vld [vmem:[#allocation5 + $0xc0] sm:$0xff]  ;;  %v72_v43 = vld [vmem:[#allocation5 + $0xd8] sm:$0xff] }
  0x31   :  { %378 = vmatpush3.bf16.msra.mxu1 %v375_v18  ;;  %v74_v39 = vld [vmem:[#allocation5 + $0xe8] sm:$0xff]  ;;  %v355_v41 = vpack.c.bf16 %v73_v37, %v70_v36  ;;  %v76_v45 = vld [vmem:[#allocation5 + $0xf8] sm:$0xff]  ;;  %v79_v46 = vld [vmem:[#allocation5 + $0x110] sm:$0xff]  ;;  %v357_v49 = vpack.c.bf16 %v72_v43, %v69_v42 }
  0x32   :  { %380 = vmatprep.subr.bf16.mxu1 %v379_v26  ;;  %v387_v44 = vpack.c.bf16 %v74_v39, %v71_v38  ;;  %v77_v47 = vld [vmem:[#allocation5 + $0x100] sm:$0xff]  ;;  %v80_v48 = vld [vmem:[#allocation5 + $0x118] sm:$0xff]  ;;  %v359_v50 = vpack.c.bf16 %v79_v46, %v76_v45  ;;  %v75_v51 = vld [vmem:[#allocation5 + $0xf0] sm:$0xff] }
  0x33   :  { %350 = vmatpush1.bf16.msra.mxu0 %v349_v31  ;;  %v78_v52 = vld [vmem:[#allocation5 + $0x108] sm:$0xff]  ;;  %v43_v53 = vld [vmem:[#allocation2] sm:$0xff]  ;;  %v391_v54 = vpack.c.bf16 %v80_v48, %v77_v47  ;;  %v85_v56 = vld [vmem:[#allocation5 + $0x140] sm:$0xff] }
  0x34   :  { %352 = vmatprep.subr.bf16.mxu0 %v351_v32  ;;  %v82_v55 = vld [vmem:[#allocation5 + $0x128] sm:$0xff]  ;;  %336 = vmatprep.mubr.f32.mxu1 %v43_v53  ;;  %v83_v57 = vld [vmem:[#allocation5 + $0x130] sm:$0xff]  ;;  %v361_v59 = vpack.c.bf16 %v78_v52, %v75_v51  ;;  %v81_v61 = vld [vmem:[#allocation5 + $0x120] sm:$0xff] }
  0x35   :  { %382 = vmatpush3.bf16.msra.mxu1 %v379_v26  ;;  %v86_v58 = vld [vmem:[#allocation5 + $0x148] sm:$0xff]  ;;  %v363_v60 = vpack.c.bf16 %v85_v56, %v82_v55  ;;  %v84_v62 = vld [vmem:[#allocation5 + $0x138] sm:$0xff]  ;;  %v91_v2 = vld [vmem:[#allocation5 + $0x170] sm:$0xff] }
  0x36   :  { %384 = vmatprep.subr.bf16.mxu1 %v383_v35  ;;  %v395_v63 = vpack.c.bf16 %v86_v58, %v83_v57  ;;  %v88_v1 = vld [vmem:[#allocation5 + $0x158] sm:$0xff]  ;;  %v89_v3 = vld [vmem:[#allocation5 + $0x160] sm:$0xff]  ;;  %v365_v5 = vpack.c.bf16 %v84_v62, %v81_v61  ;;  %v87_v7 = vld [vmem:[#allocation5 + $0x150] sm:$0xff] }
  0x37   :  { %354 = vmatpush1.bf16.msra.mxu0 %v353_v40  ;;  %v92_v4 = vld [vmem:[#allocation5 + $0x178] sm:$0xff]  ;;  %v367_v6 = vpack.c.bf16 %v91_v2, %v88_v1  ;;  %v90_v8 = vld [vmem:[#allocation5 + $0x168] sm:$0xff]  ;;  %v93_v15 = vld [vmem:[%s560_s2] sm:$0x7]  ;;  %s455_s2 = scalar_lea.vmem %s274_s14, 768 }
  0x38   :  { %356 = vmatprep.subr.bf16.mxu0 %v355_v41  ;;  %v399_v9 = vpack.c.bf16 %v92_v4, %v89_v3  ;;  %v369_v10 = vpack.c.bf16 %v90_v8, %v87_v7  ;;  %v44_v11 = vld [vmem:[#allocation2 + $0x8] sm:$0xff]  ;;  %v98_v18 = vrot.slane %v93_v15, %v97_v14  ;;  %v102_v19 = vrot.slane %v93_v15, %v101_v16  ;;  %p456_p2 = scmp.ne.s32.totalorder %s274_s14, %s455_s2  ;;  %p461_p4 = scmp.lt.s32.totalorder %s455_s2, %s455_s2 }
  0x39   :  { %386 = vmatpush3.bf16.msra.mxu1 %v383_v35  ;;  %v106_v20 = vrot.slane %v93_v15, %v105_v17 }
  0x3a   :  { %388 = vmatprep.subr.bf16.mxu1 %v387_v44  ;;  %p462_p5 = por %p461_p4, %p460_p3 }
  0x3b   :  { %358 = vmatpush1.bf16.msra.mxu0 %v357_v49 }
  0x3c   :  { %360 = vmatprep.subr.bf16.mxu0 %v359_v50  ;;  %p463_p6 = pnand %p462_p5, %p456_p2 }
  0x3d   :  { %390 = vmatpush3.bf16.msra.mxu1 %v387_v44 }
  0x3e   :  { %392 = vmatprep.subr.bf16.mxu1 %v391_v54 }
  0x3f   :  { %362 = vmatpush1.bf16.msra.mxu0 %v361_v59 }
  0x40   :  { %364 = vmatprep.subr.bf16.mxu0 %v363_v60 }
  0x41   :  { %394 = vmatpush3.bf16.msra.mxu1 %v391_v54 }
  0x42   :  { %396 = vmatprep.subr.bf16.mxu1 %v395_v63 }
  0x43   :  { %366 = vmatpush1.bf16.msra.mxu0 %v365_v5 }
  0x44   :  { %368 = vmatprep.subr.bf16.mxu0 %v367_v6 }
  0x45   :  { %398 = vmatpush3.bf16.msra.mxu1 %v395_v63 }
  0x46   :  { %400 = vmatprep.subr.bf16.mxu1 %v399_v9 }
  0x47   :  { %370 = vmatpush1.bf16.msra.mxu0 %v369_v10 }
  0x49   :  { %402 = vmatpush3.bf16.msra.mxu1 %v399_v9 }
  0x4a   :  { %175 = vmatmul.mubr.f32.vlgmr.msra.gmra.mrb[0].mxu0 %v43_v53 }
  0x4b   :  { %180 = vmatprep.mubr.f32.mxu0 %v489_v0 }
  0x4c   :  { %337 = vmatmul.mubr.f32.vlgmr.msra.gmra.mrb[0].mxu1 %v44_v11 }
  0x4e   :  { %181 = vmatmul.mubr.f32.gmra.mrb[2].mxu0 %v44_v11 }
 0x11d   :  { %v176_v21 = vpop.f32.mrb[0].mxu0 }
 0x11e   :  { %v177_v22 = vadd.f32 %v176_v21, %v98_v18  ;;  %v178_v23 = vpop.f32.mrb[1].mxu0 }
 0x11f   :  { %v338_v24 = vpop.f32.mrb[0].mxu1  ;;  %v179_v25 = vadd.f32 %v178_v23, %v102_v19 }
 0x120   :  { %v259_v0 = vadd.f32 %v338_v24, %v106_v20  ;;  %v253_v26 = vpop.f32.mrb[1].mxu1  ;;  %262 = vst [vmem:[#allocation7] sm:$0xff] %v177_v22 }
 0x121   :  { %v254_v27 = vadd.f32 %v253_v26, %v106_v20  ;;  %263 = vst [vmem:[#allocation7 + $0x8] sm:$0xff] %v179_v25  ;;  %v182_v28 = vpop.f32.mrb[2].mxu0 }
 0x122   :  { %267 = vst [vmem:[#allocation7 + $0x28] sm:$0xff] %v259_v0  ;;  %v183_v29 = vadd.f32 %v182_v28, %v98_v18  ;;  %v184_v30 = vpop.f32.mrb[3].mxu0 }
 0x123   :  { %264 = vst [vmem:[#allocation7 + $0x10] sm:$0xff] %v254_v27  ;;  %v185_v31 = vadd.f32 %v184_v30, %v102_v19 }
 0x124   :  { %265 = vst [vmem:[#allocation7 + $0x18] sm:$0xff] %v183_v29 }
 0x125   :  { %266 = vst [vmem:[#allocation7 + $0x20] sm:$0xff] %v185_v31 }
 0x126   :  { %466 = shalt.err (!%p463_p6)
}
 0x127   :  { %s467_s17 = scalar_lea.hbm %s561_s3, 768 }
 0x128   :  { %p468_p7 = scmp.ne.s32.totalorder %s561_s3, %s467_s17  ;;  %p471_p8 = scmp.lt.u32.totalorder %s467_s17, %s561_s3 }
 0x12a   :  { %p473_p9 = pnand %p471_p8, %p468_p7 }
 0x12c   :  { %476 = shalt.err (!%p473_p9)
}
 0x12d   :  { %279 = dma.vmem_to_hbm [thread:$0]  %s274_s14, 768, %s561_s3, [#allocation4], %s487_s0, %s487_s0, %s488_s9  }
 0x12e   :  { %481 = dma.done.wait [#allocation4], 768  }
 0x12f   :  { %482 = vsyncadd [#allocation4], 4294966528 }
 0x130   :  { %283 = vsyncpa [#allocation3], 1 }
 0x131   :  { %284 = vsyncpa [#allocation6], 1 }
 0x132   :  { %285 = vsyncpa [#allocation4], 1 }

</bundles_post_ra>
